<compile_context>
chip_gen: v6e
topology: v6e:2x2x1
jax: 0.10.0
libtpu: 0.0.40
codegen_flags: <defaults>
</compile_context>

<pallas_src>
import jax
import jax.numpy as jnp
from jax.experimental import pallas as pl
from jax.experimental.pallas import tpu as pltpu


# -------------------------------------------------------------------------
# Fused kernel: clamp -> 1x1 conv -> clamp -> normalize -> linear classifier
# -------------------------------------------------------------------------
def fused_forward_kernel(x_ref, w_pre_ref, b_pre_ref, mean_ref, inv_std_ref,
                         w_fc_ref, b_fc_ref, o_ref):
    # x_ref:       VMEM (N, C, HW)   activations, NCHW-flatten order, lane-dense
    # w_pre_ref:   SMEM (C, C)       1x1 conv weight, (C_in, C_out)
    # b_pre_ref:   SMEM (C,)         1x1 conv bias
    # mean_ref:    SMEM (C,)         normalization mean
    # inv_std_ref: SMEM (C,)         precomputed 1/std (no in-kernel divide)
    # w_fc_ref:    VMEM (D, K)       linear head weight, rows in NCHW order
    # b_fc_ref:    VMEM (1, K)       linear head bias
    # o_ref:       VMEM (N, K)       logits
    n, c, hw = x_ref.shape
    k = o_ref.shape[-1]

    # clamp(0, 1) before the preprocessor; one lane-dense (N, HW) slab per
    # input channel (loaded once, reused for every output channel).
    xs = [jnp.clip(x_ref[:, ci, :], 0.0, 1.0) for ci in range(c)]

    acc = jnp.zeros((n, k), jnp.float32)
    for co in range(c):
        # 1x1 conv over channels as unrolled scalar*vector multiply-adds (VPU);
        # avoids a K=N=4 MXU matmul and any NCHW<->NHWC transpose.
        y = b_pre_ref[co] + jnp.zeros((n, hw), jnp.float32)
        for ci in range(c):
            y = y + w_pre_ref[ci, co] * xs[ci]
        # clamp(0, 1) after the preprocessor, then per-channel normalize
        # (scalar multiply by 1/std instead of a per-pixel divide).
        z = (jnp.clip(y, 0.0, 1.0) - mean_ref[co]) * inv_std_ref[co]
        # fc contribution of this channel: rows [co*HW, (co+1)*HW) of w_fc
        # (static, tile-aligned slice), accumulated in f32 on the MXU.
        acc = acc + jnp.dot(z, w_fc_ref[co * hw:(co + 1) * hw, :],
                            preferred_element_type=jnp.float32)

    o_ref[...] = (acc + b_fc_ref[...]).astype(o_ref.dtype)


# -------------------------------------------------------------------------
# Wrapper: single fused pallas_call, no grid, no transposes
# -------------------------------------------------------------------------
def preprocess_model_forward(x_nchw, params):
    N, C, H, W = x_nchw.shape
    HW = H * W
    D, K = params["w_fc"].shape
    assert D == C * HW, "fc weight rows must match C*H*W (NCHW flatten)"

    x = x_nchw.reshape(N, C, HW)                     # free reshape, stays NCHW
    inv_std = 1.0 / params["std"]                    # host-side reciprocal
    b_fc = params["b_fc"].reshape(1, K)

    flops = 2 * N * HW * C * C + 2 * N * D * K
    bytes_accessed = 4 * (x.size + D * K + N * K + C * C + 3 * C + K)

    return pl.pallas_call(
        fused_forward_kernel,
        out_shape=jax.ShapeDtypeStruct((N, K), jnp.float32),
        in_specs=[
            pl.BlockSpec(memory_space=pltpu.MemorySpace.VMEM),   # x (N, C, HW)
            pl.BlockSpec(memory_space=pltpu.MemorySpace.SMEM),   # w_pre (C, C)
            pl.BlockSpec(memory_space=pltpu.MemorySpace.SMEM),   # b_pre (C,)
            pl.BlockSpec(memory_space=pltpu.MemorySpace.SMEM),   # mean (C,)
            pl.BlockSpec(memory_space=pltpu.MemorySpace.SMEM),   # inv_std (C,)
            pl.BlockSpec(memory_space=pltpu.MemorySpace.VMEM),   # w_fc (D, K)
            pl.BlockSpec(memory_space=pltpu.MemorySpace.VMEM),   # b_fc (1, K)
        ],
        out_specs=pl.BlockSpec(memory_space=pltpu.MemorySpace.VMEM),
        cost_estimate=pl.CostEstimate(flops=flops, transcendentals=0,
                                      bytes_accessed=bytes_accessed),
    )(x, params["w_pre"], params["b_pre"], params["mean"], inv_std,
      params["w_fc"], b_fc)


# -------------------------------------------------------------------------
# Pure-JAX reference mirroring the PyTorch forward (clamp->conv->clamp->norm->fc)
# -------------------------------------------------------------------------
def preprocess_model_reference(x_nchw, params):
    hp = jax.lax.Precision.HIGHEST
    x = jnp.clip(x_nchw, 0.0, 1.0)
    x = (jnp.einsum("nihw,io->nohw", x, params["w_pre"], precision=hp)
         + params["b_pre"][None, :, None, None])
    x = jnp.clip(x, 0.0, 1.0)
    x = (x - params["mean"][None, :, None, None]) / params["std"][None, :, None, None]
    feat = x.reshape(x.shape[0], -1)
    return jnp.dot(feat, params["w_fc"], precision=hp) + params["b_fc"]


if __name__ == "__main__":
    N, C, H, W = 2, 4, 16, 16
    num_classes = 10
    D = C * H * W

    key = jax.random.PRNGKey(0)
    k_x, k_wp, k_bp, k_wf, k_bf = jax.random.split(key, 5)

    # Input deliberately spills outside [0,1] to exercise the clamps.
    x = jax.random.uniform(k_x, (N, C, H, W), jnp.float32, minval=-0.2, maxval=1.2)

    params = {
        # 1x1-conv preprocessor weight stored as (C_in, C_out) plus bias.
        "w_pre": jax.random.normal(k_wp, (C, C), jnp.float32) * 0.3,
        "b_pre": jax.random.normal(k_bp, (C,), jnp.float32) * 0.1,
        # normalization constants (ImageNet-like, extended to 4 channels)
        "mean": jnp.array([0.485, 0.456, 0.406, 0.500], jnp.float32),
        "std": jnp.array([0.229, 0.224, 0.225, 0.250], jnp.float32),
        # linear base classifier over the NCHW-flattened image
        "w_fc": jax.random.normal(k_wf, (D, num_classes), jnp.float32) * 0.02,
        "b_fc": jax.random.normal(k_bf, (num_classes,), jnp.float32) * 0.01,
    }

    fwd = jax.jit(preprocess_model_forward)
    out = jax.block_until_ready(fwd(x, params))

    ref = preprocess_model_reference(x, params)
    assert out.shape == (N, num_classes)
    assert jnp.allclose(out, ref, atol=1e-4, rtol=1e-4), "mismatch vs JAX reference"

    print("KERNEL_OK")
</pallas_src>

<mosaic_0001>
module attributes {stable_mosaic.version = 11 : i64} {
  func.func @fused_forward_kernel(%arg0: memref<2x4x256xf32, #tpu.memory_space<vmem>>, %arg1: memref<4x4xf32, #tpu.memory_space<smem>>, %arg2: memref<4xf32, #tpu.memory_space<smem>>, %arg3: memref<4xf32, #tpu.memory_space<smem>>, %arg4: memref<4xf32, #tpu.memory_space<smem>>, %arg5: memref<1024x10xf32, #tpu.memory_space<vmem>>, %arg6: memref<1x10xf32, #tpu.memory_space<vmem>>, %arg7: memref<2x10xf32, #tpu.memory_space<vmem>>) attributes {dimension_semantics = [], scalar_prefetch = 0 : i64, scratch_operands = 0 : i64, tpu.core_type = #tpu.core_type<tc>} {
    %c0 = arith.constant 0 : index
    %c0_0 = arith.constant 0 : index
    %c0_1 = arith.constant 0 : index
    %0 = vector.load %arg0[%c0, %c0_0, %c0_1] : memref<2x4x256xf32, #tpu.memory_space<vmem>>, vector<2x1x256xf32>
    %1 = vector.shape_cast %0 : vector<2x1x256xf32> to vector<2x256xf32>
    %cst = arith.constant 0.000000e+00 : f32
    %cst_2 = arith.constant 1.000000e+00 : f32
    %2 = vector.broadcast %cst : f32 to vector<2x256xf32>
    %3 = arith.maximumf %2, %1 : vector<2x256xf32>
    %4 = vector.broadcast %cst_2 : f32 to vector<2x256xf32>
    %5 = arith.minimumf %4, %3 : vector<2x256xf32>
    %c0_3 = arith.constant 0 : index
    %c1 = arith.constant 1 : index
    %c0_4 = arith.constant 0 : index
    %6 = vector.load %arg0[%c0_3, %c1, %c0_4] : memref<2x4x256xf32, #tpu.memory_space<vmem>>, vector<2x1x256xf32>
    %7 = vector.shape_cast %6 : vector<2x1x256xf32> to vector<2x256xf32>
    %cst_5 = arith.constant 0.000000e+00 : f32
    %cst_6 = arith.constant 1.000000e+00 : f32
    %8 = vector.broadcast %cst_5 : f32 to vector<2x256xf32>
    %9 = arith.maximumf %8, %7 : vector<2x256xf32>
    %10 = vector.broadcast %cst_6 : f32 to vector<2x256xf32>
    %11 = arith.minimumf %10, %9 : vector<2x256xf32>
    %c0_7 = arith.constant 0 : index
    %c2 = arith.constant 2 : index
    %c0_8 = arith.constant 0 : index
    %12 = vector.load %arg0[%c0_7, %c2, %c0_8] : memref<2x4x256xf32, #tpu.memory_space<vmem>>, vector<2x1x256xf32>
    %13 = vector.shape_cast %12 : vector<2x1x256xf32> to vector<2x256xf32>
    %cst_9 = arith.constant 0.000000e+00 : f32
    %cst_10 = arith.constant 1.000000e+00 : f32
    %14 = vector.broadcast %cst_9 : f32 to vector<2x256xf32>
    %15 = arith.maximumf %14, %13 : vector<2x256xf32>
    %16 = vector.broadcast %cst_10 : f32 to vector<2x256xf32>
    %17 = arith.minimumf %16, %15 : vector<2x256xf32>
    %c0_11 = arith.constant 0 : index
    %c3 = arith.constant 3 : index
    %c0_12 = arith.constant 0 : index
    %18 = vector.load %arg0[%c0_11, %c3, %c0_12] : memref<2x4x256xf32, #tpu.memory_space<vmem>>, vector<2x1x256xf32>
    %19 = vector.shape_cast %18 : vector<2x1x256xf32> to vector<2x256xf32>
    %cst_13 = arith.constant 0.000000e+00 : f32
    %cst_14 = arith.constant 1.000000e+00 : f32
    %20 = vector.broadcast %cst_13 : f32 to vector<2x256xf32>
    %21 = arith.maximumf %20, %19 : vector<2x256xf32>
    %22 = vector.broadcast %cst_14 : f32 to vector<2x256xf32>
    %23 = arith.minimumf %22, %21 : vector<2x256xf32>
    %cst_15 = arith.constant 0.000000e+00 : f32
    %24 = vector.broadcast %cst_15 : f32 to vector<2x10xf32>
    %c0_16 = arith.constant 0 : index
    %25 = memref.load %arg2[%c0_16] : memref<4xf32, #tpu.memory_space<smem>>
    %cst_17 = arith.constant 0.000000e+00 : f32
    %26 = vector.broadcast %cst_17 : f32 to vector<2x256xf32>
    %27 = vector.broadcast %25 : f32 to vector<2x256xf32>
    %28 = arith.addf %27, %26 : vector<2x256xf32>
    %c0_18 = arith.constant 0 : index
    %c0_19 = arith.constant 0 : index
    %29 = memref.load %arg1[%c0_18, %c0_19] : memref<4x4xf32, #tpu.memory_space<smem>>
    %30 = vector.broadcast %29 : f32 to vector<2x256xf32>
    %31 = arith.mulf %30, %5 : vector<2x256xf32>
    %32 = arith.addf %28, %31 : vector<2x256xf32>
    %c1_20 = arith.constant 1 : index
    %c0_21 = arith.constant 0 : index
    %33 = memref.load %arg1[%c1_20, %c0_21] : memref<4x4xf32, #tpu.memory_space<smem>>
    %34 = vector.broadcast %33 : f32 to vector<2x256xf32>
    %35 = arith.mulf %34, %11 : vector<2x256xf32>
    %36 = arith.addf %32, %35 : vector<2x256xf32>
    %c2_22 = arith.constant 2 : index
    %c0_23 = arith.constant 0 : index
    %37 = memref.load %arg1[%c2_22, %c0_23] : memref<4x4xf32, #tpu.memory_space<smem>>
    %38 = vector.broadcast %37 : f32 to vector<2x256xf32>
    %39 = arith.mulf %38, %17 : vector<2x256xf32>
    %40 = arith.addf %36, %39 : vector<2x256xf32>
    %c3_24 = arith.constant 3 : index
    %c0_25 = arith.constant 0 : index
    %41 = memref.load %arg1[%c3_24, %c0_25] : memref<4x4xf32, #tpu.memory_space<smem>>
    %42 = vector.broadcast %41 : f32 to vector<2x256xf32>
    %43 = arith.mulf %42, %23 : vector<2x256xf32>
    %44 = arith.addf %40, %43 : vector<2x256xf32>
    %cst_26 = arith.constant 0.000000e+00 : f32
    %cst_27 = arith.constant 1.000000e+00 : f32
    %45 = vector.broadcast %cst_26 : f32 to vector<2x256xf32>
    %46 = arith.maximumf %45, %44 : vector<2x256xf32>
    %47 = vector.broadcast %cst_27 : f32 to vector<2x256xf32>
    %48 = arith.minimumf %47, %46 : vector<2x256xf32>
    %c0_28 = arith.constant 0 : index
    %49 = memref.load %arg3[%c0_28] : memref<4xf32, #tpu.memory_space<smem>>
    %50 = vector.broadcast %49 : f32 to vector<2x256xf32>
    %51 = arith.subf %48, %50 : vector<2x256xf32>
    %c0_29 = arith.constant 0 : index
    %52 = memref.load %arg4[%c0_29] : memref<4xf32, #tpu.memory_space<smem>>
    %53 = vector.broadcast %52 : f32 to vector<2x256xf32>
    %54 = arith.mulf %51, %53 : vector<2x256xf32>
    %c0_30 = arith.constant 0 : index
    %c0_31 = arith.constant 0 : index
    %55 = vector.load %arg5[%c0_30, %c0_31] : memref<1024x10xf32, #tpu.memory_space<vmem>>, vector<256x10xf32>
    %cst_32 = arith.constant dense<0.000000e+00> : vector<2x10xf32>
    %56 = tpu.matmul %54, %55, %cst_32 {dimension_numbers = #tpu.dot_dimension_numbers<[1], [0], [0], [1], [0, 0, 1, 1], [], []>} : vector<2x256xf32>, vector<256x10xf32>, vector<2x10xf32> -> vector<2x10xf32>
    %57 = arith.addf %24, %56 : vector<2x10xf32>
    %c1_33 = arith.constant 1 : index
    %58 = memref.load %arg2[%c1_33] : memref<4xf32, #tpu.memory_space<smem>>
    %cst_34 = arith.constant 0.000000e+00 : f32
    %59 = vector.broadcast %cst_34 : f32 to vector<2x256xf32>
    %60 = vector.broadcast %58 : f32 to vector<2x256xf32>
    %61 = arith.addf %60, %59 : vector<2x256xf32>
    %c0_35 = arith.constant 0 : index
    %c1_36 = arith.constant 1 : index
    %62 = memref.load %arg1[%c0_35, %c1_36] : memref<4x4xf32, #tpu.memory_space<smem>>
    %63 = vector.broadcast %62 : f32 to vector<2x256xf32>
    %64 = arith.mulf %63, %5 : vector<2x256xf32>
    %65 = arith.addf %61, %64 : vector<2x256xf32>
    %c1_37 = arith.constant 1 : index
    %c1_38 = arith.constant 1 : index
    %66 = memref.load %arg1[%c1_37, %c1_38] : memref<4x4xf32, #tpu.memory_space<smem>>
    %67 = vector.broadcast %66 : f32 to vector<2x256xf32>
    %68 = arith.mulf %67, %11 : vector<2x256xf32>
    %69 = arith.addf %65, %68 : vector<2x256xf32>
    %c2_39 = arith.constant 2 : index
    %c1_40 = arith.constant 1 : index
    %70 = memref.load %arg1[%c2_39, %c1_40] : memref<4x4xf32, #tpu.memory_space<smem>>
    %71 = vector.broadcast %70 : f32 to vector<2x256xf32>
    %72 = arith.mulf %71, %17 : vector<2x256xf32>
    %73 = arith.addf %69, %72 : vector<2x256xf32>
    %c3_41 = arith.constant 3 : index
    %c1_42 = arith.constant 1 : index
    %74 = memref.load %arg1[%c3_41, %c1_42] : memref<4x4xf32, #tpu.memory_space<smem>>
    %75 = vector.broadcast %74 : f32 to vector<2x256xf32>
    %76 = arith.mulf %75, %23 : vector<2x256xf32>
    %77 = arith.addf %73, %76 : vector<2x256xf32>
    %cst_43 = arith.constant 0.000000e+00 : f32
    %cst_44 = arith.constant 1.000000e+00 : f32
    %78 = vector.broadcast %cst_43 : f32 to vector<2x256xf32>
    %79 = arith.maximumf %78, %77 : vector<2x256xf32>
    %80 = vector.broadcast %cst_44 : f32 to vector<2x256xf32>
    %81 = arith.minimumf %80, %79 : vector<2x256xf32>
    %c1_45 = arith.constant 1 : index
    %82 = memref.load %arg3[%c1_45] : memref<4xf32, #tpu.memory_space<smem>>
    %83 = vector.broadcast %82 : f32 to vector<2x256xf32>
    %84 = arith.subf %81, %83 : vector<2x256xf32>
    %c1_46 = arith.constant 1 : index
    %85 = memref.load %arg4[%c1_46] : memref<4xf32, #tpu.memory_space<smem>>
    %86 = vector.broadcast %85 : f32 to vector<2x256xf32>
    %87 = arith.mulf %84, %86 : vector<2x256xf32>
    %c256 = arith.constant 256 : index
    %c0_47 = arith.constant 0 : index
    %88 = vector.load %arg5[%c256, %c0_47] : memref<1024x10xf32, #tpu.memory_space<vmem>>, vector<256x10xf32>
    %cst_48 = arith.constant dense<0.000000e+00> : vector<2x10xf32>
    %89 = tpu.matmul %87, %88, %cst_48 {dimension_numbers = #tpu.dot_dimension_numbers<[1], [0], [0], [1], [0, 0, 1, 1], [], []>} : vector<2x256xf32>, vector<256x10xf32>, vector<2x10xf32> -> vector<2x10xf32>
    %90 = arith.addf %57, %89 : vector<2x10xf32>
    %c2_49 = arith.constant 2 : index
    %91 = memref.load %arg2[%c2_49] : memref<4xf32, #tpu.memory_space<smem>>
    %cst_50 = arith.constant 0.000000e+00 : f32
    %92 = vector.broadcast %cst_50 : f32 to vector<2x256xf32>
    %93 = vector.broadcast %91 : f32 to vector<2x256xf32>
    %94 = arith.addf %93, %92 : vector<2x256xf32>
    %c0_51 = arith.constant 0 : index
    %c2_52 = arith.constant 2 : index
    %95 = memref.load %arg1[%c0_51, %c2_52] : memref<4x4xf32, #tpu.memory_space<smem>>
    %96 = vector.broadcast %95 : f32 to vector<2x256xf32>
    %97 = arith.mulf %96, %5 : vector<2x256xf32>
    %98 = arith.addf %94, %97 : vector<2x256xf32>
    %c1_53 = arith.constant 1 : index
    %c2_54 = arith.constant 2 : index
    %99 = memref.load %arg1[%c1_53, %c2_54] : memref<4x4xf32, #tpu.memory_space<smem>>
    %100 = vector.broadcast %99 : f32 to vector<2x256xf32>
    %101 = arith.mulf %100, %11 : vector<2x256xf32>
    %102 = arith.addf %98, %101 : vector<2x256xf32>
    %c2_55 = arith.constant 2 : index
    %c2_56 = arith.constant 2 : index
    %103 = memref.load %arg1[%c2_55, %c2_56] : memref<4x4xf32, #tpu.memory_space<smem>>
    %104 = vector.broadcast %103 : f32 to vector<2x256xf32>
    %105 = arith.mulf %104, %17 : vector<2x256xf32>
    %106 = arith.addf %102, %105 : vector<2x256xf32>
    %c3_57 = arith.constant 3 : index
    %c2_58 = arith.constant 2 : index
    %107 = memref.load %arg1[%c3_57, %c2_58] : memref<4x4xf32, #tpu.memory_space<smem>>
    %108 = vector.broadcast %107 : f32 to vector<2x256xf32>
    %109 = arith.mulf %108, %23 : vector<2x256xf32>
    %110 = arith.addf %106, %109 : vector<2x256xf32>
    %cst_59 = arith.constant 0.000000e+00 : f32
    %cst_60 = arith.constant 1.000000e+00 : f32
    %111 = vector.broadcast %cst_59 : f32 to vector<2x256xf32>
    %112 = arith.maximumf %111, %110 : vector<2x256xf32>
    %113 = vector.broadcast %cst_60 : f32 to vector<2x256xf32>
    %114 = arith.minimumf %113, %112 : vector<2x256xf32>
    %c2_61 = arith.constant 2 : index
    %115 = memref.load %arg3[%c2_61] : memref<4xf32, #tpu.memory_space<smem>>
    %116 = vector.broadcast %115 : f32 to vector<2x256xf32>
    %117 = arith.subf %114, %116 : vector<2x256xf32>
    %c2_62 = arith.constant 2 : index
    %118 = memref.load %arg4[%c2_62] : memref<4xf32, #tpu.memory_space<smem>>
    %119 = vector.broadcast %118 : f32 to vector<2x256xf32>
    %120 = arith.mulf %117, %119 : vector<2x256xf32>
    %c512 = arith.constant 512 : index
    %c0_63 = arith.constant 0 : index
    %121 = vector.load %arg5[%c512, %c0_63] : memref<1024x10xf32, #tpu.memory_space<vmem>>, vector<256x10xf32>
    %cst_64 = arith.constant dense<0.000000e+00> : vector<2x10xf32>
    %122 = tpu.matmul %120, %121, %cst_64 {dimension_numbers = #tpu.dot_dimension_numbers<[1], [0], [0], [1], [0, 0, 1, 1], [], []>} : vector<2x256xf32>, vector<256x10xf32>, vector<2x10xf32> -> vector<2x10xf32>
    %123 = arith.addf %90, %122 : vector<2x10xf32>
    %c3_65 = arith.constant 3 : index
    %124 = memref.load %arg2[%c3_65] : memref<4xf32, #tpu.memory_space<smem>>
    %cst_66 = arith.constant 0.000000e+00 : f32
    %125 = vector.broadcast %cst_66 : f32 to vector<2x256xf32>
    %126 = vector.broadcast %124 : f32 to vector<2x256xf32>
    %127 = arith.addf %126, %125 : vector<2x256xf32>
    %c0_67 = arith.constant 0 : index
    %c3_68 = arith.constant 3 : index
    %128 = memref.load %arg1[%c0_67, %c3_68] : memref<4x4xf32, #tpu.memory_space<smem>>
    %129 = vector.broadcast %128 : f32 to vector<2x256xf32>
    %130 = arith.mulf %129, %5 : vector<2x256xf32>
    %131 = arith.addf %127, %130 : vector<2x256xf32>
    %c1_69 = arith.constant 1 : index
    %c3_70 = arith.constant 3 : index
    %132 = memref.load %arg1[%c1_69, %c3_70] : memref<4x4xf32, #tpu.memory_space<smem>>
    %133 = vector.broadcast %132 : f32 to vector<2x256xf32>
    %134 = arith.mulf %133, %11 : vector<2x256xf32>
    %135 = arith.addf %131, %134 : vector<2x256xf32>
    %c2_71 = arith.constant 2 : index
    %c3_72 = arith.constant 3 : index
    %136 = memref.load %arg1[%c2_71, %c3_72] : memref<4x4xf32, #tpu.memory_space<smem>>
    %137 = vector.broadcast %136 : f32 to vector<2x256xf32>
    %138 = arith.mulf %137, %17 : vector<2x256xf32>
    %139 = arith.addf %135, %138 : vector<2x256xf32>
    %c3_73 = arith.constant 3 : index
    %c3_74 = arith.constant 3 : index
    %140 = memref.load %arg1[%c3_73, %c3_74] : memref<4x4xf32, #tpu.memory_space<smem>>
    %141 = vector.broadcast %140 : f32 to vector<2x256xf32>
    %142 = arith.mulf %141, %23 : vector<2x256xf32>
    %143 = arith.addf %139, %142 : vector<2x256xf32>
    %cst_75 = arith.constant 0.000000e+00 : f32
    %cst_76 = arith.constant 1.000000e+00 : f32
    %144 = vector.broadcast %cst_75 : f32 to vector<2x256xf32>
    %145 = arith.maximumf %144, %143 : vector<2x256xf32>
    %146 = vector.broadcast %cst_76 : f32 to vector<2x256xf32>
    %147 = arith.minimumf %146, %145 : vector<2x256xf32>
    %c3_77 = arith.constant 3 : index
    %148 = memref.load %arg3[%c3_77] : memref<4xf32, #tpu.memory_space<smem>>
    %149 = vector.broadcast %148 : f32 to vector<2x256xf32>
    %150 = arith.subf %147, %149 : vector<2x256xf32>
    %c3_78 = arith.constant 3 : index
    %151 = memref.load %arg4[%c3_78] : memref<4xf32, #tpu.memory_space<smem>>
    %152 = vector.broadcast %151 : f32 to vector<2x256xf32>
    %153 = arith.mulf %150, %152 : vector<2x256xf32>
    %c768 = arith.constant 768 : index
    %c0_79 = arith.constant 0 : index
    %154 = vector.load %arg5[%c768, %c0_79] : memref<1024x10xf32, #tpu.memory_space<vmem>>, vector<256x10xf32>
    %cst_80 = arith.constant dense<0.000000e+00> : vector<2x10xf32>
    %155 = tpu.matmul %153, %154, %cst_80 {dimension_numbers = #tpu.dot_dimension_numbers<[1], [0], [0], [1], [0, 0, 1, 1], [], []>} : vector<2x256xf32>, vector<256x10xf32>, vector<2x10xf32> -> vector<2x10xf32>
    %156 = arith.addf %123, %155 : vector<2x10xf32>
    %c0_81 = arith.constant 0 : index
    %c0_82 = arith.constant 0 : index
    %157 = vector.load %arg6[%c0_81, %c0_82] : memref<1x10xf32, #tpu.memory_space<vmem>>, vector<1x10xf32>
    %158 = vector.broadcast %157 : vector<1x10xf32> to vector<2x10xf32>
    %159 = arith.addf %156, %158 : vector<2x10xf32>
    %c0_83 = arith.constant 0 : index
    %c0_84 = arith.constant 0 : index
    %160 = vector.load %arg7[%c0_83, %c0_84] : memref<2x10xf32, #tpu.memory_space<vmem>>, vector<2x10xf32>
    tpu.vector_store %arg7[%c0_83, %c0_84], %159 {strides = array<i32>} : memref<2x10xf32, #tpu.memory_space<vmem>>, vector<2x10xf32>,
    return
  }
}

</mosaic_0001>

<bundles_post_ra>
// kernel: preprocess_model_forward.1
= control target key start
LH: loop header
LB: loop body
LE: loop exit
PB: predicated region body
PF: predicated region fallthrough
CT: control target
= control target key end

     0   :  { %12 = vsyncpa [#allocation4], 0  ;;  %s1739_s0 = inlined_call_operand.vmem [shape: f32[2,4,256], index: 0, kind: input, shape index: {}]   ;;  %s1740_s1 = inlined_call_operand.vmem [shape: f32[4,4], index: 1, kind: input, shape index: {}]   ;;  %s1741_s2 = inlined_call_operand.vmem [shape: f32[4], index: 2, kind: input, shape index: {}]   ;;  %s1742_s3 = inlined_call_operand.vmem [shape: f32[4], index: 3, kind: input, shape index: {}]   ;;  %s1743_s4 = inlined_call_operand.vmem [shape: f32[4], index: 4, kind: input, shape index: {}]   ;;  %s1744_s5 = inlined_call_operand.vmem [shape: f32[1024,10], index: 5, kind: input, shape index: {}]   ;;  %s1745_s6 = inlined_call_operand.vmem [shape: f32[1,10], index: 6, kind: input, shape index: {}]   ;;  %s1746_s7 = inlined_call_operand.hbm [shape: f32[2,10], index: 7, kind: output, shape index: {}]  }
   0x1   :  { %13 = vsyncpa [#allocation6], 0 }
   0x2   :  { %14 = vsyncpa [#allocation9], 0  ;;  %s34_s26 = sshll.u32 %s1741_s2, 4  ;;  %s35_s26 = int_to_ptr.vmem [resolvable:$true] %s34_s26 }
   0x3   :  { %15 = vsyncpa [#allocation3], 0  ;;  %s24_s29 = sshll.u32 %s1740_s1, 4  ;;  %s985_s30 = scalar_lea.vmem %s35_s26, 16  ;;  %s25_s29 = int_to_ptr.vmem [resolvable:$true] %s24_s29 }
   0x4   :  { %p986_p0 = scmp.ne.s32.totalorder %s35_s26, %s985_s30  ;;  %p990_p1 = scmp.lt.s32.totalorder %s35_s26, %s35_s26 }
   0x5   :  { %p991_p2 = scmp.lt.s32.totalorder %s985_s30, %s985_s30 }
   0x7   :  { %p992_p3 = por %p991_p2, %p990_p1 }
   0x9   :  { %p993_p4 = pnand %p992_p3, %p986_p0 }
   0xb   :  { %996 = shalt.err (!%p993_p4)
}
   0xc   :  { %s1061_s8 = smov [#allocation5]   ;;  %s997_s9 = scalar_lea.vmem %s25_s29, 64 }
   0xd   :  { %37 = dma.vmem_to_smem %s35_s26, 16, %s1061_s8, [#allocation6]  }
   0xe   :  { %p998_p5 = scmp.ne.s32.totalorder %s25_s29, %s997_s9  ;;  %p1002_p6 = scmp.lt.s32.totalorder %s25_s29, %s25_s29 }
   0xf   :  { %p1003_p7 = scmp.lt.s32.totalorder %s997_s9, %s997_s9 }
  0x11   :  { %p1004_p8 = por %p1003_p7, %p1002_p6 }
  0x13   :  { %p1005_p9 = pnand %p1004_p8, %p998_p5 }
  0x15   :  { %1008 = shalt.err (!%p1005_p9)
}
  0x16   :  { %s1062_s2 = smov [#allocation2]   ;;  %s44_s11 = sshll.u32 %s1742_s3, 4  ;;  %s45_s11 = int_to_ptr.vmem [resolvable:$true] %s44_s11 }
  0x17   :  { %27 = dma.vmem_to_smem %s25_s29, 64, %s1062_s2, [#allocation4]  }
  0x18   :  { %s54_s14 = sshll.u32 %s1743_s4, 4  ;;  %s1009_s15 = scalar_lea.vmem %s45_s11, 16  ;;  %s55_s14 = int_to_ptr.vmem [resolvable:$true] %s54_s14 }
  0x19   :  { %p1010_p10 = scmp.ne.s32.totalorder %s45_s11, %s1009_s15  ;;  %p1014_p11 = scmp.lt.s32.totalorder %s45_s11, %s45_s11 }
  0x1a   :  { %p1015_p12 = scmp.lt.s32.totalorder %s1009_s15, %s1009_s15 }
  0x1c   :  { %p1016_p13 = por %p1015_p12, %p1014_p11 }
  0x1e   :  { %p1017_p0 = pnand %p1016_p13, %p1010_p10 }
  0x20   :  { %1020 = shalt.err (!%p1017_p0)
}
  0x21   :  { %s1063_s16 = smov [#allocation7]   ;;  %s1021_s17 = scalar_lea.vmem %s55_s14, 16 }
  0x22   :  { %47 = dma.vmem_to_smem %s45_s11, 16, %s1063_s16, [#allocation6]  }
  0x23   :  { %p1022_p1 = scmp.ne.s32.totalorder %s55_s14, %s1021_s17  ;;  %p1026_p2 = scmp.lt.s32.totalorder %s55_s14, %s55_s14 }
  0x24   :  { %p1027_p3 = scmp.lt.s32.totalorder %s1021_s17, %s1021_s17 }
  0x26   :  { %p1028_p4 = por %p1027_p3, %p1026_p2 }
  0x28   :  { %p1029_p5 = pnand %p1028_p4, %p1022_p1 }
  0x2a   :  { %1032 = shalt.err (!%p1029_p5)
}
  0x2b   :  { %s1064_s3 = smov [#allocation8]  }
  0x2c   :  { %57 = dma.vmem_to_smem %s55_s14, 16, %s1064_s3, [#allocation9]  }
  0x2d   :  { %1053 = dma.done.wait [#allocation4], 64  }
  0x2e   :  { %1054 = vsyncadd [#allocation4], 4294967232 }
  0x2f   :  { %1055 = dma.done.wait [#allocation6], 32  }
  0x30   :  { %1056 = vsyncadd [#allocation6], 4294967264 }
  0x31   :  { %1057 = dma.done.wait [#allocation9], 16  }
  0x32   :  { %1058 = vsyncadd [#allocation9], 4294967280 }
  0x33   :  { %74 = sfence }
  0x34   :  { %v247_v0 = vld [vmem:[%s1744_s5 + $0x1f8] sm:$0xff]  ;;  %v246_v4 = vld [vmem:[%s1744_s5 + $0x1f0] sm:$0xff]  ;;  %v245_v8 = vld [vmem:[%s1744_s5 + $0x1e8] sm:$0xff]  ;;  %s1161_s18 = sld [smem:[#allocation5 + $0x1]]  ;;  %v254_v43 = vlaneseq  ;;  %v1065_v48 = vmov 1966171168  }
  0x35   :  { %v176_v1 = vld [vmem:[%s1744_s5 + $0xf8] sm:$0xff]  ;;  %839 = vmatprep.subr.mxu0 %v247_v0  ;;  %v175_v5 = vld [vmem:[%s1744_s5 + $0xf0] sm:$0xff]  ;;  %v174_v9 = vld [vmem:[%s1744_s5 + $0xe8] sm:$0xff]  ;;  %s1169_s23 = sld [smem:[#allocation2 + $0x1]]  ;;  %v1282_v49 = vunpack.c.l.s4 %v1065_v48  ;;  %s1066_s19 = smov [#allocation10]   ;;  %vm788_vm0 = vcmask 74752  }
  0x36   :  { %v231_v2 = vld [vmem:[%s1744_s5 + $0x178] sm:$0xff]  ;;  %874 = vmatprep.subr.mxu1 %v176_v1  ;;  %v230_v6 = vld [vmem:[%s1744_s5 + $0x170] sm:$0xff]  ;;  %v229_v10 = vld [vmem:[%s1744_s5 + $0x168] sm:$0xff]  ;;  %s1177_s28 = sld [smem:[#allocation2 + $0x81]]  ;;  %v1314_v62 = vshrl.u32 %v254_v43, 7  ;;  %s796_s20 = sshll.u32 %s1066_s19, 4  ;;  %s797_s20 = int_to_ptr.vmem [resolvable:$true] %s796_s20 }
  0x37   :  { %v160_v3 = vld [vmem:[%s1744_s5 + $0x78] sm:$0xff]  ;;  %840 = vmatpush3.msra.mxu0 %v231_v2  ;;  %v159_v7 = vld [vmem:[%s1744_s5 + $0x70] sm:$0xff]  ;;  %v158_v11 = vld [vmem:[%s1744_s5 + $0x68] sm:$0xff]  ;;  %s1185_s2 = sld [smem:[#allocation2 + $0x101]]  ;;  %p1038_p7 = scmp.lt.s32.totalorder %s797_s20, %s797_s20 }
  0x38   :  { %875 = vmatpush3.msra.mxu1 %v160_v3  ;;  %841 = vmatprep.subr.mxu0 %v246_v4  ;;  %v244_v12 = vld [vmem:[%s1744_s5 + $0x1e0] sm:$0xff]  ;;  %v243_v16 = vld [vmem:[%s1744_s5 + $0x1d8] sm:$0xff]  ;;  %v242_v20 = vld [vmem:[%s1744_s5 + $0x1d0] sm:$0xff]  ;;  %s1193_s13 = sld [smem:[#allocation2 + $0x181]]  ;;  %v253_v3 = vunpack.c.0.s8 %v1282_v49 }
  0x39   :  { %876 = vmatprep.subr.mxu1 %v175_v5  ;;  %842 = vmatpush3.msra.mxu0 %v230_v6  ;;  %v173_v13 = vld [vmem:[%s1744_s5 + $0xe0] sm:$0xff]  ;;  %v172_v17 = vld [vmem:[%s1744_s5 + $0xd8] sm:$0xff]  ;;  %v171_v21 = vld [vmem:[%s1744_s5 + $0xd0] sm:$0xff]  ;;  %s1201_s3 = sld [smem:[#allocation7 + $0x1]] }
  0x3a   :  { %877 = vmatpush3.msra.mxu1 %v159_v7  ;;  %843 = vmatprep.subr.mxu0 %v245_v8  ;;  %v228_v14 = vld [vmem:[%s1744_s5 + $0x160] sm:$0xff]  ;;  %v227_v18 = vld [vmem:[%s1744_s5 + $0x158] sm:$0xff]  ;;  %v226_v22 = vld [vmem:[%s1744_s5 + $0x150] sm:$0xff]  ;;  %s1209_s22 = sld [smem:[#allocation5]]  ;;  %v178_v38 = vstv %s1161_s18 }
  0x3b   :  { %878 = vmatprep.subr.mxu1 %v174_v9  ;;  %v157_v15 = vld [vmem:[%s1744_s5 + $0x60] sm:$0xff]  ;;  %844 = vmatpush3.msra.mxu0 %v229_v10  ;;  %v156_v19 = vld [vmem:[%s1744_s5 + $0x58] sm:$0xff]  ;;  %v155_v23 = vld [vmem:[%s1744_s5 + $0x50] sm:$0xff]  ;;  %s1217_s29 = sld [smem:[#allocation2]]  ;;  %v181_v42 = vstv %s1169_s23 }
  0x3c   :  { %879 = vmatpush3.msra.mxu1 %v158_v11  ;;  %845 = vmatprep.subr.mxu0 %v244_v12  ;;  %v241_v24 = vld [vmem:[%s1744_s5 + $0x1c8] sm:$0xff]  ;;  %v240_v28 = vld [vmem:[%s1744_s5 + $0x1c0] sm:$0xff]  ;;  %s1225_s10 = sld [smem:[#allocation2 + $0x80]]  ;;  %v239_v32 = vld [vmem:[%s1744_s5 + $0x1b8] sm:$0xff]  ;;  %v187_v47 = vstv %s1177_s28 }
  0x3d   :  { %880 = vmatprep.subr.mxu1 %v173_v13  ;;  %846 = vmatpush3.msra.mxu0 %v228_v14  ;;  %v170_v25 = vld [vmem:[%s1744_s5 + $0xc8] sm:$0xff]  ;;  %v169_v29 = vld [vmem:[%s1744_s5 + $0xc0] sm:$0xff]  ;;  %s1233_s16 = sld [smem:[#allocation2 + $0x100]]  ;;  %v168_v33 = vld [vmem:[%s1744_s5 + $0xb8] sm:$0xff]  ;;  %v193_v53 = vstv %s1185_s2 }
  0x3e   :  { %881 = vmatpush3.msra.mxu1 %v157_v15  ;;  %847 = vmatprep.subr.mxu0 %v243_v16  ;;  %v225_v26 = vld [vmem:[%s1744_s5 + $0x148] sm:$0xff]  ;;  %v224_v30 = vld [vmem:[%s1744_s5 + $0x140] sm:$0xff]  ;;  %s1241_s21 = sld [smem:[#allocation2 + $0x180]]  ;;  %v223_v34 = vld [vmem:[%s1744_s5 + $0x138] sm:$0xff]  ;;  %v199_v57 = vstv %s1193_s13 }
  0x3f   :  { %882 = vmatprep.subr.mxu1 %v172_v17  ;;  %848 = vmatpush3.msra.mxu0 %v227_v18  ;;  %v154_v27 = vld [vmem:[%s1744_s5 + $0x48] sm:$0xff]  ;;  %v153_v31 = vld [vmem:[%s1744_s5 + $0x40] sm:$0xff]  ;;  %v152_v35 = vld [vmem:[%s1744_s5 + $0x38] sm:$0xff]  ;;  %s1249_s30 = sld [smem:[#allocation5 + $0x2]]  ;;  %v209_v61 = vstv %s1201_s3 }
  0x40   :  { %883 = vmatpush3.msra.mxu1 %v156_v19  ;;  %849 = vmatprep.subr.mxu0 %v242_v20  ;;  %v238_v36 = vld [vmem:[%s1744_s5 + $0x1b0] sm:$0xff]  ;;  %s1258_s12 = sld [smem:[#allocation2 + $0x2]]  ;;  %v237_v41 = vld [vmem:[%s1744_s5 + $0x1a8] sm:$0xff]  ;;  %v236_v50 = vld [vmem:[%s1744_s5 + $0x1a0] sm:$0xff]  ;;  %v107_v4 = vstv %s1209_s22 }
  0x41   :  { %884 = vmatprep.subr.mxu1 %v171_v21  ;;  %850 = vmatpush3.msra.mxu0 %v226_v22  ;;  %v167_v37 = vld [vmem:[%s1744_s5 + $0xb0] sm:$0xff]  ;;  %s1270_s24 = sld [smem:[#allocation2 + $0x82]]  ;;  %v166_v44 = vld [vmem:[%s1744_s5 + $0xa8] sm:$0xff]  ;;  %v165_v51 = vld [vmem:[%s1744_s5 + $0xa0] sm:$0xff]  ;;  %v110_v9 = vstv %s1217_s29 }
  0x42   :  { %885 = vmatpush3.msra.mxu1 %v155_v23  ;;  %851 = vmatprep.subr.mxu0 %v241_v24  ;;  %v222_v39 = vld [vmem:[%s1744_s5 + $0x130] sm:$0xff]  ;;  %v221_v45 = vld [vmem:[%s1744_s5 + $0x128] sm:$0xff]  ;;  %v220_v52 = vld [vmem:[%s1744_s5 + $0x120] sm:$0xff]  ;;  %v116_v10 = vstv %s1225_s10  ;;  %s1339_s4 = sld [smem:[#allocation2 + $0x102]] }
  0x43   :  { %886 = vmatprep.subr.mxu1 %v170_v25  ;;  %852 = vmatpush3.msra.mxu0 %v225_v26  ;;  %v151_v40 = vld [vmem:[%s1744_s5 + $0x30] sm:$0xff]  ;;  %v150_v46 = vld [vmem:[%s1744_s5 + $0x28] sm:$0xff]  ;;  %v149_v54 = vld [vmem:[%s1744_s5 + $0x20] sm:$0xff]  ;;  %v122_v11 = vstv %s1233_s16  ;;  %s1433_s28 = sld [smem:[#allocation7]] }
  0x44   :  { %887 = vmatpush3.msra.mxu1 %v154_v27  ;;  %853 = vmatprep.subr.mxu0 %v240_v28  ;;  %v235_v55 = vld [vmem:[%s1744_s5 + $0x198] sm:$0xff]  ;;  %v75_v60 = vld [vmem:[%s1739_s0] ss:$4 sm:$0x3]  ;;  %v234_v63 = vld [vmem:[%s1744_s5 + $0x190] sm:$0xff]  ;;  %v128_v17 = vstv %s1241_s21  ;;  %s1445_s2 = sld [smem:[#allocation2 + $0x182]] }
  0x45   :  { %888 = vmatprep.subr.mxu1 %v169_v29  ;;  %854 = vmatpush3.msra.mxu0 %v224_v30  ;;  %v164_v56 = vld [vmem:[%s1744_s5 + $0x98] sm:$0xff]  ;;  %v163_v0 = vld [vmem:[%s1744_s5 + $0x90] sm:$0xff]  ;;  %v807_v1 = vld [vmem:[%s1739_s0 + $0x8] ss:$4 sm:$0x3]  ;;  %v78_v2 = vmax.f32 %v75_v60, 0.0  ;;  %v443_v18 = vstv %s1249_s30 }
  0x46   :  { %889 = vmatpush3.msra.mxu1 %v153_v31  ;;  %855 = vmatprep.subr.mxu0 %v239_v32  ;;  %v219_v58 = vld [vmem:[%s1744_s5 + $0x118] sm:$0xff]  ;;  %v218_v5 = vld [vmem:[%s1744_s5 + $0x110] sm:$0xff]  ;;  %v79_v7 = vmax.f32 %v807_v1, 0.0  ;;  %v808_v8 = vld [vmem:[%s1739_s0 + $0x1] ss:$4 sm:$0x3]  ;;  %v446_v23 = vstv %s1258_s12 }
  0x47   :  { %890 = vmatprep.subr.mxu1 %v168_v33  ;;  %856 = vmatpush3.msra.mxu0 %v223_v34  ;;  %v148_v59 = vld [vmem:[%s1744_s5 + $0x18] sm:$0xff]  ;;  %v147_v6 = vld [vmem:[%s1744_s5 + $0x10] sm:$0xff]  ;;  %v233_v12 = vld [vmem:[%s1744_s5 + $0x188] sm:$0xff]  ;;  %v1347_v14 = vmin.f32 %v78_v2, 1.0  ;;  %v86_v16 = vmax.f32 %v808_v8, 0.0  ;;  %v452_v24 = vstv %s1270_s24  ;;  %s1462_s13 = sld [smem:[#allocation8]] }
  0x48   :  { %891 = vmatpush3.msra.mxu1 %v152_v35  ;;  %857 = vmatprep.subr.mxu0 %v238_v36  ;;  %v162_v13 = vld [vmem:[%s1744_s5 + $0x88] sm:$0xff]  ;;  %v1357_v20 = vmin.f32 %v79_v7, 1.0  ;;  %v810_v22 = vld [vmem:[%s1739_s0 + $0x2] ss:$4 sm:$0x3]  ;;  %s1470_s22 = sld [smem:[#allocation5 + $0x3]] }
  0x49   :  { %892 = vmatprep.subr.mxu1 %v167_v37  ;;  %858 = vmatpush3.msra.mxu0 %v222_v39  ;;  %v809_v15 = vld [vmem:[%s1739_s0 + $0x9] ss:$4 sm:$0x3]  ;;  %v1367_v26 = vmin.f32 %v86_v16, 1.0  ;;  %v94_v28 = vmax.f32 %v810_v22, 0.0  ;;  %v182_v29 = vmul.f32 %v181_v42, %v1347_v14  ;;  %v111_v30 = vmul.f32 %v110_v9, %v1347_v14  ;;  %v232_v31 = vld [vmem:[%s1744_s5 + $0x180] sm:$0xff] }
  0x4a   :  { %893 = vmatpush3.msra.mxu1 %v151_v40  ;;  %859 = vmatprep.subr.mxu0 %v237_v41  ;;  %v217_v19 = vld [vmem:[%s1744_s5 + $0x108] sm:$0xff]  ;;  %v87_v21 = vmax.f32 %v809_v15, 0.0  ;;  %v812_v34 = vld [vmem:[%s1739_s0 + $0x3] ss:$4 sm:$0x3]  ;;  %v183_v35 = vmul.f32 %v181_v42, %v1357_v20  ;;  %v112_v36 = vmul.f32 %v110_v9, %v1357_v20  ;;  %v447_v16 = vmul.f32 %v446_v23, %v1347_v14  ;;  %s1478_s10 = sld [smem:[#allocation2 + $0x3]] }
  0x4b   :  { %894 = vmatprep.subr.mxu1 %v166_v44  ;;  %860 = vmatpush3.msra.mxu0 %v221_v45  ;;  %v146_v25 = vld [vmem:[%s1744_s5 + $0x8] sm:$0xff]  ;;  %v161_v37 = vld [vmem:[%s1744_s5 + $0x80] sm:$0xff]  ;;  %v1391_v39 = vmin.f32 %v94_v28, 1.0  ;;  %v102_v41 = vmax.f32 %v812_v34, 0.0  ;;  %v184_v42 = vadd.f32 %v182_v29, %v178_v38  ;;  %v188_v43 = vmul.f32 %v187_v47, %v1367_v26  ;;  %s1488_s16 = sld [smem:[#allocation2 + $0x83]] }
  0x4c   :  { %895 = vmatpush3.msra.mxu1 %v150_v46  ;;  %861 = vmatprep.subr.mxu0 %v236_v50  ;;  %v811_v27 = vld [vmem:[%s1739_s0 + $0xa] ss:$4 sm:$0x3]  ;;  %v1379_v32 = vmin.f32 %v87_v21, 1.0  ;;  %v216_v44 = vld [vmem:[%s1744_s5 + $0x100] sm:$0xff]  ;;  %v185_v50 = vadd.f32 %v183_v35, %v178_v38  ;;  %v512_v38 = vld [vmem:[%s1744_s5 + $0x2f8] sm:$0xff]  ;;  %v114_v60 = vadd.f32 %v112_v36, %v107_v4  ;;  %v117_v2 = vmul.f32 %v116_v10, %v1367_v26 }
  0x4d   :  { %896 = vmatprep.subr.mxu1 %v165_v51  ;;  %862 = vmatpush3.msra.mxu0 %v220_v52  ;;  %v95_v33 = vmax.f32 %v811_v27, 0.0  ;;  %v813_v40 = vld [vmem:[%s1739_s0 + $0xb] ss:$4 sm:$0x3]  ;;  %v145_v45 = vld [vmem:[%s1744_s5] sm:$0xff]  ;;  %v1414_v52 = vmin.f32 %v102_v41, 1.0  ;;  %v123_v7 = vmul.f32 %v122_v11, %v1391_v39  ;;  %v448_v21 = vmul.f32 %v446_v23, %v1357_v20 }
  0x4e   :  { %897 = vmatpush3.msra.mxu1 %v149_v54  ;;  %863 = vmatprep.subr.mxu0 %v235_v55  ;;  %v103_v48 = vmax.f32 %v813_v40, 0.0  ;;  %v189_v51 = vmul.f32 %v187_v47, %v1379_v32  ;;  %v190_v54 = vadd.f32 %v188_v43, %v184_v42  ;;  %v194_v55 = vmul.f32 %v193_v53, %v1391_v39  ;;  %s1419_s0 = sld [smem:[#allocation8 + $0x1]] }
  0x4f   :  { %898 = vmatprep.subr.mxu1 %v164_v56  ;;  %864 = vmatpush3.msra.mxu0 %v219_v58  ;;  %v1407_v46 = vmin.f32 %v95_v33, 1.0  ;;  %v113_v56 = vadd.f32 %v111_v30, %v107_v4  ;;  %v200_v1 = vmul.f32 %v199_v57, %v1414_v52  ;;  %v453_v22 = vmul.f32 %v452_v24, %v1367_v26  ;;  %s1504_s21 = sld [smem:[#allocation2 + $0x103]] }
  0x50   :  { %899 = vmatpush3.msra.mxu1 %v148_v59  ;;  %865 = vmatprep.subr.mxu0 %v234_v63  ;;  %v1426_v47 = vmin.f32 %v103_v48, 1.0  ;;  %v191_v58 = vadd.f32 %v189_v51, %v185_v50  ;;  %v681_v63 = vld [vmem:[%s1744_s5 + $0x3f8] sm:$0xff]  ;;  %v449_v27 = vadd.f32 %v447_v16, %v443_v18  ;;  %v454_v28 = vmul.f32 %v452_v24, %v1379_v32  ;;  %s1510_s3 = sld [smem:[#allocation2 + $0x183]] }
  0x51   :  { %900 = vmatprep.subr.mxu1 %v163_v0  ;;  %866 = vmatpush3.msra.mxu0 %v218_v5  ;;  %v195_v59 = vmul.f32 %v193_v53, %v1407_v46  ;;  %v196_v0 = vadd.f32 %v194_v55, %v190_v54  ;;  %v458_v53 = vstv %s1339_s4  ;;  %v119_v9 = vadd.f32 %v117_v2, %v113_v56  ;;  %s1522_s30 = sld [smem:[#allocation7 + $0x2]] }
  0x52   :  { %901 = vmatpush3.msra.mxu1 %v147_v6  ;;  %867 = vmatprep.subr.mxu0 %v233_v12  ;;  %v201_v5 = vmul.f32 %v199_v57, %v1426_v47  ;;  %v118_v6 = vmul.f32 %v116_v10, %v1379_v32  ;;  %v124_v12 = vmul.f32 %v122_v11, %v1407_v46  ;;  %v138_v41 = vstv %s1433_s28  ;;  %s1530_s4 = sld [smem:[#allocation7 + $0x3]] }
  0x53   :  { %902 = vmatprep.subr.mxu1 %v162_v13  ;;  %868 = vmatpush3.msra.mxu0 %v217_v19  ;;  %v197_v4 = vadd.f32 %v195_v59, %v191_v58  ;;  %v202_v8 = vadd.f32 %v200_v1, %v196_v0  ;;  %v129_v13 = vmul.f32 %v128_v17, %v1414_v52  ;;  %v464_v42 = vstv %s1445_s2  ;;  %s1545_s1 = sld [smem:[#allocation8 + $0x2]]  ;;  %s1033_s2 = scalar_lea.vmem %s797_s20, 32 }
  0x54   :  { %903 = vmatpush3.msra.mxu1 %v146_v25  ;;  %869 = vmatprep.subr.mxu0 %v232_v31  ;;  %v120_v10 = vadd.f32 %v118_v6, %v114_v60  ;;  %v130_v15 = vmul.f32 %v128_v17, %v1426_v47  ;;  %v125_v19 = vadd.f32 %v123_v7, %v119_v9  ;;  %v213_v30 = vstv %s1419_s0  ;;  %s1553_s0 = sld [smem:[#allocation8 + $0x3]]  ;;  %p1034_p6 = scmp.ne.s32.totalorder %s797_s20, %s1033_s2 }
  0x55   :  { %904 = vmatprep.subr.mxu1 %v161_v37  ;;  %870 = vmatpush3.msra.mxu0 %v216_v44  ;;  %v203_v57 = vadd.f32 %v201_v5, %v197_v4  ;;  %v204_v11 = vmax.f32 %v202_v8, 0.0  ;;  %v450_v23 = vadd.f32 %v448_v21, %v443_v18  ;;  %v455_v35 = vadd.f32 %v453_v22, %v449_v27  ;;  %p1039_p8 = scmp.lt.s32.totalorder %s1033_s2, %s1033_s2 }
  0x56   :  { %905 = vmatpush3.msra.mxu1 %v145_v45  ;;  %909 = vmatprep.subr.mxu0 %v512_v38  ;;  %v126_v17 = vadd.f32 %v124_v12, %v120_v10  ;;  %v131_v31 = vadd.f32 %v129_v13, %v125_v19  ;;  %v459_v36 = vmul.f32 %v458_v53, %v1391_v39  ;;  %v142_v51 = vstv %s1462_s13 }
  0x57   :  { %944 = vmatprep.subr.mxu1 %v681_v63  ;;  %v205_v25 = vmax.f32 %v203_v57, 0.0  ;;  %v206_v29 = vmin.f32 %v204_v11, 1.0  ;;  %v456_v44 = vadd.f32 %v454_v28, %v450_v23  ;;  %v460_v18 = vmul.f32 %v458_v53, %v1407_v46  ;;  %p1040_p9 = por %p1039_p8, %p1038_p7 }
  0x58   :  { %v132_v34 = vadd.f32 %v130_v15, %v126_v17  ;;  %v133_v40 = vmax.f32 %v131_v31, 0.0  ;;  %v1501_v48 = vsub.s32 %v253_v3, %v1314_v62  ;;  %v461_v56 = vadd.f32 %v459_v36, %v455_v35  ;;  %v494_v35 = vld [vmem:[%s1744_s5 + $0x268] sm:$0xff]  ;;  %v680_v36 = vld [vmem:[%s1744_s5 + $0x3f0] sm:$0xff] }
  0x59   :  { %v207_v33 = vmin.f32 %v205_v25, 1.0  ;;  %v210_v37 = vsub.f32 %v206_v29, %v209_v61  ;;  %v466_v58 = vmul.f32 %v464_v42, %v1426_v47  ;;  %v612_v59 = vstv %s1470_s22  ;;  %v511_v25 = vld [vmem:[%s1744_s5 + $0x2f0] sm:$0xff]  ;;  %p1041_p10 = pnand %p1040_p9, %p1034_p6 }
  0x5a   :  { %v134_v43 = vmax.f32 %v132_v34, 0.0  ;;  %v135_v50 = vmin.f32 %v133_v40, 1.0  ;;  %v615_v60 = vstv %s1478_s10  ;;  %v462_v3 = vadd.f32 %v460_v18, %v456_v44  ;;  %v665_v34 = vld [vmem:[%s1744_s5 + $0x378] sm:$0xff]  ;;  %v679_v18 = vld [vmem:[%s1744_s5 + $0x3e8] sm:$0xff] }
  0x5b   :  { %v211_v24 = vsub.f32 %v207_v33, %v209_v61  ;;  %v214_v45 = vmul.f32 %v213_v30, %v210_v37  ;;  %v465_v61 = vmul.f32 %v464_v42, %v1414_v52  ;;  %v616_v63 = vmul.f32 %v615_v60, %v1347_v14  ;;  %v510_v33 = vld [vmem:[%s1744_s5 + $0x2e8] sm:$0xff]  ;;  %v509_v37 = vld [vmem:[%s1744_s5 + $0x2e0] sm:$0xff] }
  0x5c   :  { %v136_v55 = vmin.f32 %v134_v43, 1.0  ;;  %v139_v38 = vsub.f32 %v135_v50, %v138_v41  ;;  %v617_v1 = vmul.f32 %v615_v60, %v1357_v20  ;;  %v621_v2 = vstv %s1488_s16  ;;  %v493_v42 = vld [vmem:[%s1744_s5 + $0x260] sm:$0xff]  ;;  %v491_v60 = vld [vmem:[%s1744_s5 + $0x250] sm:$0xff] }
  0x5d   :  { %v215_v54 = vmul.f32 %v213_v30, %v211_v24  ;;  %v618_v5 = vadd.f32 %v616_v63, %v612_v59  ;;  %v622_v7 = vmul.f32 %v621_v2, %v1367_v26  ;;  %v623_v8 = vmul.f32 %v621_v2, %v1379_v32  ;;  %v496_v32 = vld [vmem:[%s1744_s5 + $0x278] sm:$0xff]  ;;  %v506_v63 = vld [vmem:[%s1744_s5 + $0x2c8] sm:$0xff] }
  0x5e   :  { %v140_v62 = vsub.f32 %v136_v55, %v138_v41  ;;  %v143_v0 = vmul.f32 %v142_v51, %v139_v38  ;;  %v619_v6 = vadd.f32 %v617_v1, %v612_v59  ;;  %v467_v13 = vadd.f32 %v465_v61, %v461_v56  ;;  %v664_v41 = vld [vmem:[%s1744_s5 + $0x370] sm:$0xff]  ;;  %v492_v55 = vld [vmem:[%s1744_s5 + $0x258] sm:$0xff]  ;;  %v678_v38 = vld [vmem:[%s1744_s5 + $0x3e0] sm:$0xff] }
  0x5f   :  { %v250_v49 = vcombine.low %v214_v45, %v215_v54  ;;  %v468_v57 = vadd.f32 %v466_v58, %v462_v3  ;;  %v624_v10 = vadd.f32 %v622_v7, %v618_v5  ;;  %v627_v20 = vstv %s1504_s21  ;;  %v508_v45 = vld [vmem:[%s1744_s5 + $0x2d8] sm:$0xff]  ;;  %v663_v54 = vld [vmem:[%s1744_s5 + $0x368] sm:$0xff]  ;;  %v507_v58 = vld [vmem:[%s1744_s5 + $0x2d0] sm:$0xff] }
  0x60   :  { %v144_v4 = vmul.f32 %v142_v51, %v140_v62  ;;  %v625_v15 = vadd.f32 %v623_v8, %v619_v6  ;;  %v628_v26 = vmul.f32 %v627_v20, %v1391_v39  ;;  %v629_v19 = vmul.f32 %v627_v20, %v1407_v46  ;;  %v495_v46 = vld [vmem:[%s1744_s5 + $0x270] sm:$0xff]  ;;  %v662_v59 = vld [vmem:[%s1744_s5 + $0x360] sm:$0xff]  ;;  %v677_v3 = vld [vmem:[%s1744_s5 + $0x3d8] sm:$0xff] }
  0x61   :  { %v257_v53 = vrot.slane %v250_v49, %v1501_v48  ;;  %v633_v21 = vstv %s1510_s3  ;;  %v469_v17 = vmax.f32 %v467_v13, 0.0  ;;  %v470_v29 = vmax.f32 %v468_v57, 0.0  ;;  %v676_v6 = vld [vmem:[%s1744_s5 + $0x3d0] sm:$0xff]  ;;  %v505_v7 = vld [vmem:[%s1744_s5 + $0x2c0] sm:$0xff]  ;;  %v675_v57 = vld [vmem:[%s1744_s5 + $0x3c8] sm:$0xff] }
  0x62   :  { %v347_v12 = vcombine.low %v143_v0, %v144_v4  ;;  %v630_v27 = vadd.f32 %v628_v26, %v624_v10  ;;  %v634_v28 = vmul.f32 %v633_v21, %v1414_v52  ;;  %v631_v30 = vadd.f32 %v629_v19, %v625_v15  ;;  %v490_v4 = vld [vmem:[%s1744_s5 + $0x248] sm:$0xff]  ;;  %v660_v8 = vld [vmem:[%s1744_s5 + $0x350] sm:$0xff] }
  0x63   :  { %v258_v9 = vcombine.high %v257_v53, %v257_v53  ;;  %v265_v14 = vrot.slane %v257_v53, %v1501_v48  ;;  %v635_v31 = vmul.f32 %v633_v21, %v1426_v47  ;;  %v471_v24 = vmin.f32 %v469_v17, 1.0  ;;  %v661_v53 = vld [vmem:[%s1744_s5 + $0x358] sm:$0xff]  ;;  %v659_v20 = vld [vmem:[%s1744_s5 + $0x348] sm:$0xff]  ;;  %v503_v26 = vld [vmem:[%s1744_s5 + $0x2b0] sm:$0xff] }
  0x64   :  { %v354_v11 = vrot.slane %v347_v12, %v1501_v48  ;;  %v636_v52 = vadd.f32 %v634_v28, %v630_v27  ;;  %v472_v43 = vmin.f32 %v470_v29, 1.0  ;;  %v474_v50 = vstv %s1522_s30  ;;  %v487_v19 = vld [vmem:[%s1744_s5 + $0x230] sm:$0xff]  ;;  %v657_v27 = vld [vmem:[%s1744_s5 + $0x338] sm:$0xff]  ;;  %v486_v28 = vld [vmem:[%s1744_s5 + $0x228] sm:$0xff] }
  0x65   :  { %v272_v16 = vrot.slane %v258_v9, %v1501_v48  ;;  %v637_v47 = vadd.f32 %v635_v31, %v631_v30  ;;  %v643_v61 = vstv %s1530_s4  ;;  %v475_v49 = vsub.f32 %v471_v24, %v474_v50  ;;  %v489_v9 = vld [vmem:[%s1744_s5 + $0x240] sm:$0xff]  ;;  %v656_v29 = vld [vmem:[%s1744_s5 + $0x330] sm:$0xff]  ;;  %v498_v24 = vld [vmem:[%s1744_s5 + $0x288] sm:$0xff] }
  0x66   :  { %v355_v22 = vcombine.high %v354_v11, %v354_v11  ;;  %v362_v39 = vrot.slane %v354_v11, %v1501_v48  ;;  %v638_v40 = vmax.f32 %v636_v52, 0.0  ;;  %v476_v62 = vsub.f32 %v472_v43, %v474_v50  ;;  %v674_v11 = vld [vmem:[%s1744_s5 + $0x3c0] sm:$0xff] }
  0x67   :  { %339 = vmatprep.mubr.f32.mxu0 %v272_v16  ;;  %v639_v44 = vmax.f32 %v637_v47, 0.0  ;;  %v478_v0 = vstv %s1545_s1  ;;  %v647_v5 = vstv %s1553_s0  ;;  %v488_v16 = vld [vmem:[%s1744_s5 + $0x238] sm:$0xff]  ;;  %v485_v30 = vld [vmem:[%s1744_s5 + $0x220] sm:$0xff] }
  0x68   :  { %340 = vmatmul.mubr.f32.vlgmr.msra.gmra.mxu0 %v265_v14  ;;  %v369_v23 = vrot.slane %v355_v22, %v1501_v48  ;;  %v640_v51 = vmin.f32 %v638_v40, 1.0  ;;  %v479_v12 = vmul.f32 %v478_v0, %v475_v49  ;;  %v480_v13 = vmul.f32 %v478_v0, %v476_v62  ;;  %v504_v14 = vld [vmem:[%s1744_s5 + $0x2b8] sm:$0xff]  ;;  %v670_v47 = vld [vmem:[%s1744_s5 + $0x3a0] sm:$0xff]  ;;  %v483_v40 = vld [vmem:[%s1744_s5 + $0x210] sm:$0xff] }
  0x69   :  { %910 = vmatpush3.msra.mxu0 %v496_v32  ;;  %v641_v56 = vmin.f32 %v639_v44, 1.0  ;;  %v658_v32 = vld [vmem:[%s1744_s5 + $0x340] sm:$0xff]  ;;  %v673_v22 = vld [vmem:[%s1744_s5 + $0x3b8] sm:$0xff] }
  0x6a   :  { %911 = vmatprep.subr.mxu0 %v511_v25  ;;  %436 = vmatprep.mubr.f32.mxu1 %v369_v23  ;;  %v644_v1 = vsub.f32 %v640_v51, %v643_v61  ;;  %v515_v21 = vcombine.low %v479_v12, %v480_v13  ;;  %v502_v25 = vld [vmem:[%s1744_s5 + $0x2a8] sm:$0xff]  ;;  %v653_v44 = vld [vmem:[%s1744_s5 + $0x318] sm:$0xff]  ;;  %v497_v50 = vld [vmem:[%s1744_s5 + $0x280] sm:$0xff] }
  0x6b   :  { %912 = vmatpush3.msra.mxu0 %v495_v46  ;;  %437 = vmatmul.mubr.f32.vlgmr.msra.gmra.mxu1 %v362_v39  ;;  %v645_v2 = vsub.f32 %v641_v56, %v643_v61  ;;  %v672_v39 = vld [vmem:[%s1744_s5 + $0x3b0] sm:$0xff]  ;;  %v501_v46 = vld [vmem:[%s1744_s5 + $0x2a0] sm:$0xff]  ;;  %v671_v23 = vld [vmem:[%s1744_s5 + $0x3a8] sm:$0xff] }
  0x6c   :  { %913 = vmatprep.subr.mxu0 %v510_v33  ;;  %945 = vmatpush3.msra.mxu1 %v665_v34  ;;  %v648_v10 = vmul.f32 %v647_v5, %v644_v1  ;;  %v522_v31 = vrot.slane %v515_v21, %v1501_v48  ;;  %v500_v33 = vld [vmem:[%s1744_s5 + $0x298] sm:$0xff]  ;;  %v655_v34 = vld [vmem:[%s1744_s5 + $0x328] sm:$0xff]  ;;  %v652_v51 = vld [vmem:[%s1744_s5 + $0x310] sm:$0xff] }
  0x6d   :  { %914 = vmatpush3.msra.mxu0 %v494_v35  ;;  %946 = vmatprep.subr.mxu1 %v680_v36  ;;  %v649_v15 = vmul.f32 %v647_v5, %v645_v2  ;;  %v484_v35 = vld [vmem:[%s1744_s5 + $0x218] sm:$0xff]  ;;  %v499_v36 = vld [vmem:[%s1744_s5 + $0x290] sm:$0xff]  ;;  %v667_v56 = vld [vmem:[%s1744_s5 + $0x388] sm:$0xff] }
  0x6e   :  { %915 = vmatprep.subr.mxu0 %v509_v37  ;;  %947 = vmatpush3.msra.mxu1 %v664_v41  ;;  %v654_v37 = vld [vmem:[%s1744_s5 + $0x320] sm:$0xff]  ;;  %v523_v41 = vcombine.high %v522_v31, %v522_v31 }
  0x6f   :  { %916 = vmatpush3.msra.mxu0 %v493_v42  ;;  %948 = vmatprep.subr.mxu1 %v679_v18  ;;  %v684_v17 = vcombine.low %v648_v10, %v649_v15  ;;  %v669_v42 = vld [vmem:[%s1744_s5 + $0x398] sm:$0xff]  ;;  %v482_v18 = vld [vmem:[%s1744_s5 + $0x208] sm:$0xff]  ;;  %v838_v12 = vld [vmem:[%s1745_s6] ss:$0 sm:$0xff] }
  0x70   :  { %917 = vmatprep.subr.mxu0 %v508_v45  ;;  %949 = vmatpush3.msra.mxu1 %v663_v54  ;;  %v668_v45 = vld [vmem:[%s1744_s5 + $0x390] sm:$0xff]  ;;  %v481_v54 = vld [vmem:[%s1744_s5 + $0x200] sm:$0xff] }
  0x71   :  { %918 = vmatpush3.msra.mxu0 %v492_v55  ;;  %950 = vmatprep.subr.mxu1 %v678_v38  ;;  %v691_v52 = vrot.slane %v684_v17, %v1501_v48  ;;  %v537_v55 = vrot.slane %v523_v41, %v1501_v48  ;;  %v651_v38 = vld [vmem:[%s1744_s5 + $0x308] sm:$0xff] }
  0x72   :  { %919 = vmatprep.subr.mxu0 %v507_v58  ;;  %951 = vmatpush3.msra.mxu1 %v662_v59  ;;  %v530_v58 = vrot.slane %v522_v31, %v1501_v48  ;;  %v666_v59 = vld [vmem:[%s1744_s5 + $0x380] sm:$0xff] }
  0x73   :  { %920 = vmatpush3.msra.mxu0 %v491_v60  ;;  %952 = vmatprep.subr.mxu1 %v677_v3  ;;  %v692_v43 = vcombine.high %v691_v52, %v691_v52  ;;  %v650_v60 = vld [vmem:[%s1744_s5 + $0x300] sm:$0xff]  ;;  %v699_v49 = vrot.slane %v691_v52, %v1501_v48 }
  0x74   :  { %921 = vmatprep.subr.mxu0 %v506_v63  ;;  %953 = vmatpush3.msra.mxu1 %v661_v53 }
  0x75   :  { %922 = vmatpush3.msra.mxu0 %v490_v4  ;;  %954 = vmatprep.subr.mxu1 %v676_v6  ;;  %v706_v61 = vrot.slane %v692_v43, %v1501_v48 }
  0x76   :  { %923 = vmatprep.subr.mxu0 %v505_v7  ;;  %955 = vmatpush3.msra.mxu1 %v660_v8 }
  0x77   :  { %924 = vmatpush3.msra.mxu0 %v489_v9  ;;  %956 = vmatprep.subr.mxu1 %v675_v57 }
  0x78   :  { %925 = vmatprep.subr.mxu0 %v504_v14  ;;  %957 = vmatpush3.msra.mxu1 %v659_v20 }
  0x79   :  { %926 = vmatpush3.msra.mxu0 %v488_v16  ;;  %958 = vmatprep.subr.mxu1 %v674_v11 }
  0x7a   :  { %927 = vmatprep.subr.mxu0 %v503_v26  ;;  %959 = vmatpush3.msra.mxu1 %v658_v32 }
  0x7b   :  { %928 = vmatpush3.msra.mxu0 %v487_v19  ;;  %960 = vmatprep.subr.mxu1 %v673_v22 }
  0x7c   :  { %929 = vmatprep.subr.mxu0 %v502_v25  ;;  %961 = vmatpush3.msra.mxu1 %v657_v27 }
  0x7d   :  { %930 = vmatpush3.msra.mxu0 %v486_v28  ;;  %962 = vmatprep.subr.mxu1 %v672_v39 }
  0x7e   :  { %931 = vmatprep.subr.mxu0 %v501_v46  ;;  %963 = vmatpush3.msra.mxu1 %v656_v29 }
  0x7f   :  { %932 = vmatpush3.msra.mxu0 %v485_v30  ;;  %964 = vmatprep.subr.mxu1 %v671_v23 }
  0x80   :  { %933 = vmatprep.subr.mxu0 %v500_v33  ;;  %965 = vmatpush3.msra.mxu1 %v655_v34 }
  0x81   :  { %934 = vmatpush3.msra.mxu0 %v484_v35  ;;  %966 = vmatprep.subr.mxu1 %v670_v47 }
  0x82   :  { %935 = vmatprep.subr.mxu0 %v499_v36  ;;  %967 = vmatpush3.msra.mxu1 %v654_v37 }
  0x83   :  { %936 = vmatpush3.msra.mxu0 %v483_v40  ;;  %968 = vmatprep.subr.mxu1 %v669_v42 }
  0x84   :  { %937 = vmatprep.subr.mxu0 %v498_v24  ;;  %969 = vmatpush3.msra.mxu1 %v653_v44 }
  0x85   :  { %938 = vmatpush3.msra.mxu0 %v482_v18  ;;  %970 = vmatprep.subr.mxu1 %v668_v45 }
  0x86   :  { %939 = vmatprep.subr.mxu0 %v497_v50  ;;  %971 = vmatpush3.msra.mxu1 %v652_v51 }
  0x87   :  { %940 = vmatpush3.msra.mxu0 %v481_v54  ;;  %972 = vmatprep.subr.mxu1 %v667_v56 }
  0x88   :  { %604 = vmatprep.mubr.f32.mxu0 %v537_v55  ;;  %973 = vmatpush3.msra.mxu1 %v651_v38 }
  0x89   :  { %773 = vmatprep.mubr.f32.mxu1 %v706_v61  ;;  %974 = vmatprep.subr.mxu1 %v666_v59 }
  0x8a   :  { %605 = vmatmul.mubr.f32.vlgmr.msra.gmra.mxu0 %v530_v58  ;;  %975 = vmatpush3.msra.mxu1 %v650_v60 }
  0x8b   :  { %774 = vmatmul.mubr.f32.vlgmr.msra.gmra.mxu1 %v699_v49 }
 0x128   :  { %v871_v62 = vpop.f32.mrf.mxu0 }
 0x12a   :  { %v872_v63 = vpop.f32.mrf.mxu0 }
 0x12b   :  { %v906_v3 = vpop.f32.mrf.mxu1  ;;  %v873_v1 = vadd.f32 %v872_v63, %v871_v62 }
 0x12d   :  { %v907_v0 = vpop.f32.mrf.mxu1 }
 0x12e   :  { %v908_v2 = vadd.f32 %v907_v0, %v906_v3 }
 0x130   :  { %v439_v6 = vadd.f32 %v908_v2, %v873_v1 }
 0x14a   :  { %v941_v53 = vpop.f32.mrf.mxu0 }
 0x14b   :  { %v976_v4 = vpop.f32.mrf.mxu1 }
 0x14c   :  { %v942_v5 = vpop.f32.mrf.mxu0 }
 0x14d   :  { %v943_v7 = vadd.f32 %v942_v5, %v941_v53  ;;  %v977_v8 = vpop.f32.mrf.mxu1 }
 0x14e   :  { %v978_v48 = vadd.f32 %v977_v8, %v976_v4 }
 0x14f   :  { %v610_v9 = vadd.f32 %v943_v7, %v439_v6 }
 0x151   :  { %v779_v13 = vadd.f32 %v978_v48, %v610_v9 }
 0x153   :  { %v787_v57 = vadd.f32 %v838_v12, %v779_v13 }
 0x155   :  { %789 = vst.msk [vmem:[#allocation10] sm:$0x3] %vm788_vm0, %v787_v57 }
 0x156   :  { %1044 = shalt.err (!%p1041_p10)
}
 0x157   :  { %799 = dma.vmem_to_hbm [thread:$0]  %s797_s20, 32, %s1746_s7, [#allocation3]  }
 0x158   :  { %1059 = dma.done.wait [#allocation3], 32  }
 0x159   :  { %1060 = vsyncadd [#allocation3], 4294967264 }
 0x15a   :  { %803 = vsyncpa [#allocation3], 1 }
 0x15b   :  { %804 = vsyncpa [#allocation4], 1 }
 0x15c   :  { %805 = vsyncpa [#allocation6], 1 }
 0x15d   :  { %806 = vsyncpa [#allocation9], 1 }

</bundles_post_ra>
